<compile_context>
chip_gen: v5e
topology: v5e:2x2
jax: 0.10.0
libtpu: 0.0.40
codegen_flags: <defaults>
</compile_context>

<pallas_src>
import jax
import jax.numpy as jnp
from jax.experimental import pallas as pl
from jax.experimental.pallas import tpu as pltpu

KH = KW = 3     # conv kernel size
POOL = 3        # MaxPool2d(kernel_size=3) -> kernel 3, stride 3, no padding
PP = POOL * POOL


def conv_pool_kernel(p_ref, w_ref, b_ref, o_ref):
    # p_ref: (PP*R, K)  pool-window-grouped im2col rows
    # w_ref: (K, Cout)  flattened conv weights
    # b_ref: (1, Cout)  bias
    # o_ref: (R, Cout)  pooled output rows (R = N*Hp*Wp)
    R = o_ref.shape[0]

    # Conv for all 9 pool-window positions in ONE MXU matmul.
    acc = jnp.dot(p_ref[...], w_ref[...], preferred_element_type=jnp.float32)

    # Max-pool = pairwise max tree over the 9 row-groups (32-row,
    # 4-sublane-tile aligned static slices) -- cheap independent VPU work.
    parts = [acc[p * R:(p + 1) * R] for p in range(PP)]
    while len(parts) > 1:
        nxt = [jnp.maximum(parts[i], parts[i + 1])
               for i in range(0, len(parts) - 1, 2)]
        if len(parts) % 2:
            nxt.append(parts[-1])
        parts = nxt

    # Bias after pooling (identical result; touches R rows instead of PP*R).
    o_ref[...] = (parts[0] + b_ref[...]).astype(o_ref.dtype)


def conv_maxpool(x_nchw, w_oihw, b):
    """x_nchw: (N, Cin, H, W); w_oihw: (Cout, Cin, KH, KW); b: (Cout,)."""
    N, Cin, H, W = x_nchw.shape
    Cout = w_oihw.shape[0]
    Ho, Wo = H - KH + 1, W - KW + 1
    Hp, Wp = Ho // POOL, Wo // POOL
    K = KH * KW * Cin
    R = N * Hp * Wp

    x_nhwc = jnp.transpose(x_nchw, (0, 2, 3, 1))             # (N, H, W, Cin)
    w_flat = jnp.transpose(w_oihw, (2, 3, 1, 0)).reshape(K, Cout)
    b2 = b.reshape(1, Cout)

    # Wrapper-side im2col, grouped by pool-window position, pre-flattened:
    #   patches[p*R + r, (kh*KW+kw)*Cin + ci]
    #       = x[n, POOL*oh + i + kh, POOL*ow + j + kw, ci]
    #   with p = i*POOL + j and r = n*Hp*Wp + oh*Wp + ow.
    taps = [x_nhwc[:, kh:kh + POOL * Hp, kw:kw + POOL * Wp, :]
            for kh in range(KH) for kw in range(KW)]
    full = jnp.concatenate(taps, axis=-1)                    # (N, 3Hp, 3Wp, K)
    full = full.reshape(N, Hp, POOL, Wp, POOL, K)            # [n, oh, i, ow, j, k]
    patches = jnp.transpose(full, (2, 4, 0, 1, 3, 5)).reshape(PP * R, K)

    out = pl.pallas_call(
        conv_pool_kernel,
        out_shape=jax.ShapeDtypeStruct((R, Cout), x_nchw.dtype),
        in_specs=[
            pl.BlockSpec(memory_space=pltpu.MemorySpace.VMEM),   # patches
            pl.BlockSpec(memory_space=pltpu.MemorySpace.VMEM),   # weights
            pl.BlockSpec(memory_space=pltpu.MemorySpace.VMEM),   # bias
        ],
        out_specs=pl.BlockSpec(memory_space=pltpu.MemorySpace.VMEM),
    )(patches, w_flat, b2)

    pooled = out.reshape(N, Hp, Wp, Cout)
    return jnp.transpose(pooled, (0, 3, 1, 2))                # back to NCHW


def reference(x, w, b):
    conv = jax.lax.conv_general_dilated(
        x, w, window_strides=(1, 1), padding="VALID",
        dimension_numbers=("NCHW", "OIHW", "NCHW"))
    conv = conv + b[None, :, None, None]
    return jax.lax.reduce_window(
        conv, -jnp.inf, jax.lax.max,
        window_dimensions=(1, 1, POOL, POOL),
        window_strides=(1, 1, POOL, POOL),
        padding="VALID")


if __name__ == "__main__":
    key = jax.random.PRNGKey(0)
    kx, kw, kb = jax.random.split(key, 3)

    # Input matching my_module's forward: NCHW, 3 input channels.
    x = jax.random.normal(kx, (2, 3, 16, 16), dtype=jnp.float32)

    # Deterministic parameter init (PyTorch Conv2d default: U(-1/sqrt(fan_in), ..)).
    fan_in = 3 * KH * KW
    bound = 1.0 / (fan_in ** 0.5)
    w = jax.random.uniform(kw, (12, 3, KH, KW), jnp.float32, -bound, bound)
    b = jax.random.uniform(kb, (12,), jnp.float32, -bound, bound)

    y = jax.block_until_ready(conv_maxpool(x, w, b))

    y_ref = reference(x, w, b)
    assert y.shape == (2, 12, 4, 4), y.shape
    assert jnp.allclose(y, y_ref, atol=1e-4, rtol=1e-4), "mismatch vs reference"
    print("KERNEL_OK")
</pallas_src>

<mosaic_0001>
module attributes {stable_mosaic.version = 11 : i64} {
  func.func @conv_pool_kernel(%arg0: memref<288x27xf32, #tpu.memory_space<vmem>>, %arg1: memref<27x12xf32, #tpu.memory_space<vmem>>, %arg2: memref<1x12xf32, #tpu.memory_space<vmem>>, %arg3: memref<32x12xf32, #tpu.memory_space<vmem>>) attributes {dimension_semantics = [], scalar_prefetch = 0 : i64, scratch_operands = 0 : i64, tpu.core_type = #tpu.core_type<tc>} {
    %c0 = arith.constant 0 : index
    %c0_0 = arith.constant 0 : index
    %0 = vector.load %arg0[%c0, %c0_0] : memref<288x27xf32, #tpu.memory_space<vmem>>, vector<288x27xf32>
    %c0_1 = arith.constant 0 : index
    %c0_2 = arith.constant 0 : index
    %1 = vector.load %arg1[%c0_1, %c0_2] : memref<27x12xf32, #tpu.memory_space<vmem>>, vector<27x12xf32>
    %cst = arith.constant dense<0.000000e+00> : vector<288x12xf32>
    %2 = tpu.matmul %0, %1, %cst {dimension_numbers = #tpu.dot_dimension_numbers<[1], [0], [0], [1], [0, 0, 1, 1], [], []>} : vector<288x27xf32>, vector<27x12xf32>, vector<288x12xf32> -> vector<288x12xf32>
    %3 = vector.extract_strided_slice %2 {offsets = [0, 0], sizes = [32, 12], strides = [1, 1]} : vector<288x12xf32> to vector<32x12xf32>
    %4 = vector.extract_strided_slice %2 {offsets = [32, 0], sizes = [32, 12], strides = [1, 1]} : vector<288x12xf32> to vector<32x12xf32>
    %5 = vector.extract_strided_slice %2 {offsets = [64, 0], sizes = [32, 12], strides = [1, 1]} : vector<288x12xf32> to vector<32x12xf32>
    %6 = vector.extract_strided_slice %2 {offsets = [96, 0], sizes = [32, 12], strides = [1, 1]} : vector<288x12xf32> to vector<32x12xf32>
    %7 = vector.extract_strided_slice %2 {offsets = [128, 0], sizes = [32, 12], strides = [1, 1]} : vector<288x12xf32> to vector<32x12xf32>
    %8 = vector.extract_strided_slice %2 {offsets = [160, 0], sizes = [32, 12], strides = [1, 1]} : vector<288x12xf32> to vector<32x12xf32>
    %9 = vector.extract_strided_slice %2 {offsets = [192, 0], sizes = [32, 12], strides = [1, 1]} : vector<288x12xf32> to vector<32x12xf32>
    %10 = vector.extract_strided_slice %2 {offsets = [224, 0], sizes = [32, 12], strides = [1, 1]} : vector<288x12xf32> to vector<32x12xf32>
    %11 = vector.extract_strided_slice %2 {offsets = [256, 0], sizes = [32, 12], strides = [1, 1]} : vector<288x12xf32> to vector<32x12xf32>
    %12 = arith.maximumf %3, %4 : vector<32x12xf32>
    %13 = arith.maximumf %5, %6 : vector<32x12xf32>
    %14 = arith.maximumf %7, %8 : vector<32x12xf32>
    %15 = arith.maximumf %9, %10 : vector<32x12xf32>
    %16 = arith.maximumf %12, %13 : vector<32x12xf32>
    %17 = arith.maximumf %14, %15 : vector<32x12xf32>
    %18 = arith.maximumf %16, %17 : vector<32x12xf32>
    %19 = arith.maximumf %18, %11 : vector<32x12xf32>
    %c0_3 = arith.constant 0 : index
    %c0_4 = arith.constant 0 : index
    %20 = vector.load %arg2[%c0_3, %c0_4] : memref<1x12xf32, #tpu.memory_space<vmem>>, vector<1x12xf32>
    %21 = vector.broadcast %20 : vector<1x12xf32> to vector<32x12xf32>
    %22 = arith.addf %19, %21 : vector<32x12xf32>
    %c0_5 = arith.constant 0 : index
    %c0_6 = arith.constant 0 : index
    %23 = vector.load %arg3[%c0_5, %c0_6] : memref<32x12xf32, #tpu.memory_space<vmem>>, vector<32x12xf32>
    tpu.vector_store %arg3[%c0_5, %c0_6], %22 {strides = array<i32>} : memref<32x12xf32, #tpu.memory_space<vmem>>, vector<32x12xf32>,
    return
  }
}

</mosaic_0001>

<bundles_post_ra>
// kernel: tpu_custom_call.1
= control target key start
LH: loop header
LB: loop body
LE: loop exit
PB: predicated region body
PF: predicated region fallthrough
CT: control target
= control target key end

     0   :  { %vm163_vm0 = vcmask 1042432   ;;  %vm54_vm1 = vcmask 220160   ;;  %vm332_vm2 = vcmask 97280   ;;  %s588_s1 = inlined_call_operand.vmem [shape: f32[27,12], index: 1, kind: input, shape index: {}]   ;;  %s589_s0 = inlined_call_operand.vmem [shape: f32[288,27], index: 0, kind: input, shape index: {}]   ;;  %s590_s2 = inlined_call_operand.vmem [shape: f32[1,12], index: 2, kind: input, shape index: {}]   ;;  %s591_s3 = inlined_call_operand.vmem [shape: f32[32,12], index: 3, kind: output, shape index: {}]  }
   0x1   :  { %v53_v0 = vld [vmem:[%s588_s1 + $0x18] sm:$0x7]  ;;  %v52_v1 = vld [vmem:[%s588_s1 + $0x10] sm:$0xff]  ;;  %v51_v2 = vld [vmem:[%s588_s1 + $0x8] sm:$0xff] }
   0x2   :  { %341 = vmatpush.msk.msra.mxu0 %vm163_vm0, %v53_v0  ;;  %378 = vmatpush.msk.msra.mxu1 %vm163_vm0, %v53_v0  ;;  %v50_v3 = vld [vmem:[%s588_s1] sm:$0xff]  ;;  %v23_v5 = vld [vmem:[%s589_s0 + $0x48] sm:$0xff]  ;;  %v32_v6 = vld [vmem:[%s589_s0 + $0x90] sm:$0xff] }
   0x3   :  { %379 = vmatpush.msk.msra.mxu2 %vm163_vm0, %v53_v0  ;;  %380 = vmatpush.msk.msra.mxu3 %vm163_vm0, %v53_v0  ;;  %v14_v4 = vld [vmem:[%s589_s0] sm:$0xff]  ;;  %v41_v7 = vld [vmem:[%s589_s0 + $0xd8] sm:$0xff]  ;;  %v15_v8 = vld [vmem:[%s589_s0 + $0x8] sm:$0xff] }
   0x4   :  { %180 = vmatpush.msra.mxu0 %v52_v1  ;;  %381 = vmatpush.msra.mxu1 %v52_v1  ;;  %v24_v9 = vld [vmem:[%s589_s0 + $0x50] sm:$0xff]  ;;  %v33_v10 = vld [vmem:[%s589_s0 + $0x98] sm:$0xff]  ;;  %v42_v11 = vld [vmem:[%s589_s0 + $0xe0] sm:$0xff] }
   0x5   :  { %382 = vmatpush.msra.mxu2 %v52_v1  ;;  %383 = vmatpush.msra.mxu3 %v52_v1  ;;  %v16_v12 = vld [vmem:[%s589_s0 + $0x10] sm:$0xff]  ;;  %v25_v13 = vld [vmem:[%s589_s0 + $0x58] sm:$0xff]  ;;  %v34_v14 = vld [vmem:[%s589_s0 + $0xa0] sm:$0xff] }
   0x6   :  { %181 = vmatpush.msra.mxu0 %v51_v2  ;;  %384 = vmatpush.msra.mxu1 %v51_v2  ;;  %v43_v15 = vld [vmem:[%s589_s0 + $0xe8] sm:$0xff]  ;;  %v17_v16 = vld [vmem:[%s589_s0 + $0x18] sm:$0xff]  ;;  %v26_v17 = vld [vmem:[%s589_s0 + $0x60] sm:$0xff] }
   0x7   :  { %385 = vmatpush.msra.mxu2 %v51_v2  ;;  %386 = vmatpush.msra.mxu3 %v51_v2  ;;  %v35_v18 = vld [vmem:[%s589_s0 + $0xa8] sm:$0xff]  ;;  %v44_v19 = vld [vmem:[%s589_s0 + $0xf0] sm:$0xff]  ;;  %v18_v20 = vld [vmem:[%s589_s0 + $0x20] sm:$0xff] }
   0x8   :  { %182 = vmatpush.msra.mxu0 %v50_v3  ;;  %387 = vmatpush.msra.mxu1 %v50_v3  ;;  %v27_v21 = vld [vmem:[%s589_s0 + $0x68] sm:$0xff]  ;;  %v36_v22 = vld [vmem:[%s589_s0 + $0xb0] sm:$0xff]  ;;  %v45_v23 = vld [vmem:[%s589_s0 + $0xf8] sm:$0xff] }
   0x9   :  { %388 = vmatpush.msra.mxu2 %v50_v3  ;;  %389 = vmatpush.msra.mxu3 %v50_v3  ;;  %v19_v24 = vld [vmem:[%s589_s0 + $0x28] sm:$0xff]  ;;  %v28_v25 = vld [vmem:[%s589_s0 + $0x70] sm:$0xff]  ;;  %v37_v26 = vld [vmem:[%s589_s0 + $0xb8] sm:$0xff] }
   0xa   :  { %342 = vmatmul.msk.f32.vlgmr.msra.gmra.mxu0 %vm54_vm1, %v14_v4  ;;  %351 = vmatmul.msk.f32.vlgmr.msra.gmra.mxu1 %vm54_vm1, %v23_v5  ;;  %v46_v27 = vld [vmem:[%s589_s0 + $0x100] sm:$0xff]  ;;  %v20_v28 = vld [vmem:[%s589_s0 + $0x30] sm:$0xff]  ;;  %v29_v29 = vld [vmem:[%s589_s0 + $0x78] sm:$0xff] }
   0xb   :  { %360 = vmatmul.msk.f32.vlgmr.msra.gmra.mxu2 %vm54_vm1, %v32_v6  ;;  %369 = vmatmul.msk.f32.vlgmr.msra.gmra.mxu3 %vm54_vm1, %v41_v7  ;;  %v38_v30 = vld [vmem:[%s589_s0 + $0xc0] sm:$0xff]  ;;  %v47_v31 = vld [vmem:[%s589_s0 + $0x108] sm:$0xff]  ;;  %v21_v32 = vld [vmem:[%s589_s0 + $0x38] sm:$0xff] }
   0xc   :  { %v30_v33 = vld [vmem:[%s589_s0 + $0x80] sm:$0xff]  ;;  %v39_v34 = vld [vmem:[%s589_s0 + $0xc8] sm:$0xff]  ;;  %v48_v35 = vld [vmem:[%s589_s0 + $0x110] sm:$0xff] }
   0xd   :  { %v22_v36 = vld [vmem:[%s589_s0 + $0x40] sm:$0xff]  ;;  %v31_v37 = vld [vmem:[%s589_s0 + $0x88] sm:$0xff]  ;;  %v40_v38 = vld [vmem:[%s589_s0 + $0xd0] sm:$0xff] }
   0xe   :  { %v49_v39 = vld [vmem:[%s589_s0 + $0x118] sm:$0xff] }
  0x12   :  { %343 = vmatmul.msk.f32.gmra.mxu0 %vm54_vm1, %v15_v8  ;;  %352 = vmatmul.msk.f32.gmra.mxu1 %vm54_vm1, %v24_v9 }
  0x13   :  { %361 = vmatmul.msk.f32.gmra.mxu2 %vm54_vm1, %v33_v10  ;;  %370 = vmatmul.msk.f32.gmra.mxu3 %vm54_vm1, %v42_v11 }
  0x1a   :  { %344 = vmatmul.msk.f32.gmra.mxu0 %vm54_vm1, %v16_v12  ;;  %353 = vmatmul.msk.f32.gmra.mxu1 %vm54_vm1, %v25_v13 }
  0x1b   :  { %362 = vmatmul.msk.f32.gmra.mxu2 %vm54_vm1, %v34_v14  ;;  %371 = vmatmul.msk.f32.gmra.mxu3 %vm54_vm1, %v43_v15 }
  0x22   :  { %345 = vmatmul.msk.f32.gmra.mxu0 %vm54_vm1, %v17_v16  ;;  %354 = vmatmul.msk.f32.gmra.mxu1 %vm54_vm1, %v26_v17 }
  0x23   :  { %363 = vmatmul.msk.f32.gmra.mxu2 %vm54_vm1, %v35_v18  ;;  %372 = vmatmul.msk.f32.gmra.mxu3 %vm54_vm1, %v44_v19 }
  0x2a   :  { %346 = vmatmul.msk.f32.gmra.mxu0 %vm54_vm1, %v18_v20  ;;  %355 = vmatmul.msk.f32.gmra.mxu1 %vm54_vm1, %v27_v21 }
  0x2b   :  { %364 = vmatmul.msk.f32.gmra.mxu2 %vm54_vm1, %v36_v22  ;;  %373 = vmatmul.msk.f32.gmra.mxu3 %vm54_vm1, %v45_v23 }
  0x32   :  { %347 = vmatmul.msk.f32.gmra.mxu0 %vm54_vm1, %v19_v24  ;;  %356 = vmatmul.msk.f32.gmra.mxu1 %vm54_vm1, %v28_v25 }
  0x33   :  { %365 = vmatmul.msk.f32.gmra.mxu2 %vm54_vm1, %v37_v26  ;;  %374 = vmatmul.msk.f32.gmra.mxu3 %vm54_vm1, %v46_v27 }
  0x3a   :  { %348 = vmatmul.msk.f32.gmra.mxu0 %vm54_vm1, %v20_v28  ;;  %357 = vmatmul.msk.f32.gmra.mxu1 %vm54_vm1, %v29_v29  ;;  %v390_v29 = vld [vmem:[%s590_s2] ss:$0 sm:$0xff] }
  0x3b   :  { %366 = vmatmul.msk.f32.gmra.mxu2 %vm54_vm1, %v38_v30  ;;  %375 = vmatmul.msk.f32.gmra.mxu3 %vm54_vm1, %v47_v31 }
  0x42   :  { %349 = vmatmul.msk.f32.gmra.mxu0 %vm54_vm1, %v21_v32  ;;  %358 = vmatmul.msk.f32.gmra.mxu1 %vm54_vm1, %v30_v33 }
  0x43   :  { %367 = vmatmul.msk.f32.gmra.mxu2 %vm54_vm1, %v39_v34  ;;  %376 = vmatmul.msk.f32.gmra.mxu3 %vm54_vm1, %v48_v35 }
  0x4a   :  { %350 = vmatmul.msk.f32.gmra.mxu0 %vm54_vm1, %v22_v36  ;;  %359 = vmatmul.msk.f32.gmra.mxu1 %vm54_vm1, %v31_v37 }
  0x4b   :  { %368 = vmatmul.msk.f32.gmra.mxu2 %vm54_vm1, %v40_v38  ;;  %377 = vmatmul.msk.f32.gmra.mxu3 %vm54_vm1, %v49_v39 }
  0x87   :  { %v184_v40 = vpop.f32.mrf.mxu0  ;;  %v211_v41 = vpop.f32.mrf.mxu1 }
  0x8e   :  { %v567_v42 = vpop.f32.mrf.mxu2  ;;  %v265_v43 = vpop.f32.mrf.mxu3 }
  0x8f   :  { %v187_v44 = vpop.f32.mrf.mxu0  ;;  %v569_v45 = vpop.f32.mrf.mxu1 }
  0x96   :  { %v241_v46 = vpop.f32.mrf.mxu2  ;;  %v268_v47 = vpop.f32.mrf.mxu3 }
  0x97   :  { %v190_v48 = vpop.f32.mrf.mxu0  ;;  %v217_v49 = vpop.f32.mrf.mxu1 }
  0x9e   :  { %v244_v50 = vpop.f32.mrf.mxu2  ;;  %v271_v51 = vpop.f32.mrf.mxu3 }
  0x9f   :  { %v193_v52 = vpop.f32.mrf.mxu0  ;;  %v220_v53 = vpop.f32.mrf.mxu1 }
  0xa6   :  { %v247_v54 = vpop.f32.mrf.mxu2  ;;  %v274_v55 = vpop.f32.mrf.mxu3 }
  0xa7   :  { %v196_v56 = vpop.f32.mrf.mxu0  ;;  %v223_v57 = vpop.f32.mrf.mxu1 }
  0xa8   :  { %v292_v11 = vmax.f32 %v184_v40, %v196_v56  ;;  %v297_v12 = vmax.f32 %v211_v41, %v223_v57 }
  0xae   :  { %v250_v58 = vpop.f32.mrf.mxu2  ;;  %v277_v59 = vpop.f32.mrf.mxu3 }
  0xaf   :  { %v199_v60 = vpop.f32.mrf.mxu0  ;;  %v226_v61 = vpop.f32.mrf.mxu1  ;;  %v307_v21 = vmax.f32 %v265_v43, %v277_v59  ;;  %v302_v33 = vmax.f32 %v567_v42, %v250_v58 }
  0xb0   :  { %v293_v7 = vmax.f32 %v187_v44, %v199_v60  ;;  %v298_v38 = vmax.f32 %v569_v45, %v226_v61 }
  0xb2   :  { %v309_v23 = vmax.f32 %v293_v7, %v297_v12 }
  0xb6   :  { %v253_v62 = vpop.f32.mrf.mxu2  ;;  %v280_v63 = vpop.f32.mrf.mxu3 }
  0xb7   :  { %v202_v0 = vpop.f32.mrf.mxu0  ;;  %v229_v1 = vpop.f32.mrf.mxu1  ;;  %v303_v13 = vmax.f32 %v241_v46, %v253_v62 }
  0xb8   :  { %v299_v14 = vmax.f32 %v217_v49, %v229_v1  ;;  %v294_v31 = vmax.f32 %v190_v48, %v202_v0 }
  0xb9   :  { %v315_v27 = vmax.f32 %v303_v13, %v307_v21 }
  0xba   :  { %v310_v44 = vmax.f32 %v294_v31, %v298_v38 }
  0xbe   :  { %v256_v2 = vpop.f32.mrf.mxu2  ;;  %v283_v3 = vpop.f32.mrf.mxu3 }
  0xbf   :  { %v205_v4 = vpop.f32.mrf.mxu0  ;;  %v232_v5 = vpop.f32.mrf.mxu1  ;;  %v304_v17 = vmax.f32 %v256_v2, %v268_v47 }
  0xc0   :  { %v295_v6 = vmax.f32 %v193_v52, %v205_v4  ;;  %v300_v8 = vmax.f32 %v232_v5, %v244_v50 }
  0xc2   :  { %v311_v22 = vmax.f32 %v295_v6, %v299_v14  ;;  %v312_v24 = vmax.f32 %v300_v8, %v304_v17 }
  0xc4   :  { %v319_v32 = vmax.f32 %v311_v22, %v315_v27 }
  0xc6   :  { %v259_v9 = vpop.f32.mrf.mxu2  ;;  %v286_v10 = vpop.f32.mrf.mxu3 }
  0xc7   :  { %v208_v15 = vpop.f32.mrf.mxu0  ;;  %v235_v16 = vpop.f32.mrf.mxu1  ;;  %v305_v18 = vmax.f32 %v259_v9, %v271_v51 }
  0xc8   :  { %v296_v19 = vmax.f32 %v208_v15, %v220_v53  ;;  %v301_v20 = vmax.f32 %v235_v16, %v247_v54 }
  0xca   :  { %v308_v25 = vmax.f32 %v292_v11, %v296_v19  ;;  %v313_v26 = vmax.f32 %v301_v20, %v305_v18 }
  0xcc   :  { %v316_v28 = vmax.f32 %v308_v25, %v312_v24  ;;  %v317_v30 = vmax.f32 %v309_v23, %v313_v26 }
  0xce   :  { %v320_v34 = vmax.f32 %v316_v28, %v280_v63  ;;  %v321_v35 = vmax.f32 %v317_v30, %v283_v3  ;;  %v262_v36 = vpop.f32.mrf.mxu2  ;;  %v289_v37 = vpop.f32.mrf.mxu3 }
  0xcf   :  { %v306_v39 = vmax.f32 %v262_v36, %v274_v55  ;;  %v323_v40 = vmax.f32 %v319_v32, %v289_v37 }
  0xd0   :  { %v328_v41 = vadd.f32 %v390_v29, %v320_v34  ;;  %v329_v43 = vadd.f32 %v390_v29, %v321_v35 }
  0xd1   :  { %v314_v46 = vmax.f32 %v302_v33, %v306_v39  ;;  %v331_v47 = vadd.f32 %v390_v29, %v323_v40 }
  0xd2   :  { %333 = vst.msk [vmem:[%s591_s3] sm:$0xff] %vm332_vm2, %v328_v41 }
  0xd3   :  { %v318_v48 = vmax.f32 %v310_v44, %v314_v46  ;;  %334 = vst.msk [vmem:[%s591_s3 + $0x8] sm:$0xff] %vm332_vm2, %v329_v43 }
  0xd4   :  { %336 = vst.msk [vmem:[%s591_s3 + $0x18] sm:$0xff] %vm332_vm2, %v331_v47 }
  0xd5   :  { %v322_v42 = vmax.f32 %v318_v48, %v286_v10 }
  0xd7   :  { %v330_v45 = vadd.f32 %v390_v29, %v322_v42 }
  0xd9   :  { %335 = vst.msk [vmem:[%s591_s3 + $0x10] sm:$0xff] %vm332_vm2, %v330_v45 }

</bundles_post_ra>
